<compile_context>
chip_gen: v7x
topology: tpu7x:2x2x1
jax: 0.10.0
libtpu: 0.0.40
codegen_flags: <defaults>
</compile_context>

<pallas_src>
import jax
import jax.numpy as jnp
import numpy as np
from jax.experimental import pallas as pl
from jax.experimental.pallas import tpu as pltpu

EPS = 1e-5
LEAKY_SLOPE = 0.3
MM_DTYPE = jnp.bfloat16          # MXU operand dtype (accumulation stays f32)


# ---------------------------------------------------------------------------
# shared helpers
# ---------------------------------------------------------------------------
def _bn_scale_shift(mean, var, gamma, beta):
    """Fold training-mode BatchNorm stats into a per-channel scale/shift."""
    scale = gamma * jax.lax.rsqrt(var + EPS)
    return scale, beta - mean * scale


def _conv3_lhs(h):
    """(L, C) -> (L, 3C) fused-conv LHS; row l = [h[l-1], h[l], h[l+1]] with
    zeros outside the sequence.  Kernel-only (uses pltpu.roll + edge mask)."""
    l, c = h.shape
    row = jax.lax.broadcasted_iota(jnp.int32, (l, c), 0)
    h_m1 = jnp.where(row == 0, 0.0, pltpu.roll(h, 1, axis=0))          # h[l-1]
    h_p1 = jnp.where(row == l - 1, 0.0, pltpu.roll(h, l - 1, axis=0))  # h[l+1]
    return jnp.concatenate([h_m1, h, h_p1], axis=-1).astype(MM_DTYPE)


# ---------------------------------------------------------------------------
# stage 1: BN1 (precomputed stats) -> ReLU -> Conv1d(k=3, 'same');
#          also emits per-tile (sum, sum^2) partials for the BN2 batch stats.
# ---------------------------------------------------------------------------
def _stage1_kernel(x_ref, sc1_ref, sh1_ref, w1_ref, b1_ref, h1_ref, stats_ref):
    x = x_ref[0]                                               # (L, Cin) f32
    h = jnp.maximum(x * sc1_ref[...] + sh1_ref[...], 0.0)      # BN1 + ReLU
    h1 = jnp.dot(_conv3_lhs(h), w1_ref[...],                   # one fused MXU matmul
                 preferred_element_type=jnp.float32) + b1_ref[...]
    h1_ref[0] = h1

    # single-sweep partial stats for BN2 (combined across tiles in the wrapper)
    s = jnp.sum(h1, axis=0, keepdims=True)                     # (1, Cout)
    ss = jnp.sum(h1 * h1, axis=0, keepdims=True)               # (1, Cout)
    row = jax.lax.broadcasted_iota(jnp.int32, stats_ref.shape[1:], 0)
    stats_ref[0] = jnp.where(row == 0, s, jnp.where(row == 1, ss, 0.0))


# ---------------------------------------------------------------------------
# stage 2: BN2 (precomputed stats) -> LeakyReLU(0.3) -> Conv1d(k=3)
#          + chan_resizer(x) residual -> MaxPool1d(3) -> FMS gate.
# ---------------------------------------------------------------------------
def _stage2_kernel(h1_ref, x_ref, sc2_ref, sh2_ref, w2_ref, b2_ref,
                   wr_ref, br_ref, wf_ref, bf_ref, out_ref, res_ref):
    h1 = h1_ref[0]                                             # (L, Cout) f32
    x = x_ref[0]                                               # (L, Cin) f32
    lp = out_ref.shape[1]

    h = h1 * sc2_ref[...] + sh2_ref[...]                       # BN2
    h = jnp.where(h > 0, h, LEAKY_SLOPE * h)                   # LeakyReLU(0.3)
    h = jnp.dot(_conv3_lhs(h), w2_ref[...],
                preferred_element_type=jnp.float32) + b2_ref[...]

    xr = jnp.dot(x.astype(MM_DTYPE), wr_ref[...],              # 1x1 chan_resizer
                 preferred_element_type=jnp.float32) + br_ref[...]
    res_ref[...] = h + xr                                      # full-length residual in VMEM

    # MaxPool1d(kernel=3, stride=3, floor): max of the three stride-3 phases
    p0 = res_ref[pl.ds(0, lp, stride=3), :]
    p1 = res_ref[pl.ds(1, lp, stride=3), :]
    p2 = res_ref[pl.ds(2, lp, stride=3), :]
    pooled = jnp.maximum(jnp.maximum(p0, p1), p2)              # (Lp, Cout)

    # FMS: gate = sigmoid(Linear(global mean)); out = gate * x + gate
    avg = jnp.mean(pooled, axis=0, keepdims=True)              # (1, Cout)
    gate = jax.nn.sigmoid(
        jnp.dot(avg.astype(MM_DTYPE), wf_ref[...],
                preferred_element_type=jnp.float32) + bf_ref[...])
    out_ref[0] = (gate * pooled + gate).astype(out_ref.dtype)


# ---------------------------------------------------------------------------
# wrapper + deterministic parameter init
# ---------------------------------------------------------------------------
def init_params(key, cin, cout):
    ks = jax.random.split(key, 6)

    def rnd(k, shape, scale=0.1):
        return scale * jax.random.normal(k, shape, dtype=jnp.float32)

    return dict(
        bn1_gamma=jnp.ones((1, cin), jnp.float32),   # PyTorch BN init: gamma=1
        bn1_beta=jnp.zeros((1, cin), jnp.float32),   #                  beta=0
        conv1_w=rnd(ks[0], (3, cin, cout)),          # torch (Cout,Cin,3) -> (k,Cin,Cout)
        conv1_b=rnd(ks[1], (1, cout)),
        bn2_gamma=jnp.ones((1, cout), jnp.float32),
        bn2_beta=jnp.zeros((1, cout), jnp.float32),
        conv2_w=rnd(ks[2], (3, cout, cout)),
        conv2_b=rnd(ks[3], (1, cout)),
        resize_w=rnd(ks[4], (cin, cout)),            # torch (Cout,Cin,1) -> (Cin,Cout)
        resize_b=rnd(ks[5], (1, cout)),
        fms_w=rnd(jax.random.fold_in(key, 7), (cout, cout)),  # pre-transposed: y = x @ W + b
        fms_b=rnd(jax.random.fold_in(key, 8), (1, cout)),
    )


def resblock_forward(x_ncl, params):
    """x_ncl: (N, Cin, L)  ->  (N, Cout, L // 3), matching the PyTorch module."""
    n, cin, l = x_ncl.shape
    cout = params["conv1_w"].shape[-1]
    lp = l // 3
    x = jnp.transpose(x_ncl, (0, 2, 1)).astype(jnp.float32)    # NCL -> NLC

    # --- matmul weights: stacked conv taps, bf16 MXU operands -------------
    w1s = params["conv1_w"].reshape(3 * cin, cout).astype(MM_DTYPE)
    w2s = params["conv2_w"].reshape(3 * cout, cout).astype(MM_DTYPE)
    wr = params["resize_w"].astype(MM_DTYPE)
    wf = params["fms_w"].astype(MM_DTYPE)

    # --- BN1 training-mode batch statistics (cheap (Cin,) reduction) ------
    mean1 = jnp.mean(x, axis=(0, 1))
    var1 = jnp.mean((x - mean1) ** 2, axis=(0, 1))
    sc1, sh1 = _bn_scale_shift(mean1, var1,
                               params["bn1_gamma"][0], params["bn1_beta"][0])
    sc1 = sc1.reshape(1, cin)
    sh1 = sh1.reshape(1, cin)

    cp = pltpu.CompilerParams(dimension_semantics=("parallel",),
                              vmem_limit_bytes=32 * 1024 * 1024)

    # --- stage 1: per-sample tiles over the batch grid --------------------
    h1, stats = pl.pallas_call(
        _stage1_kernel,
        out_shape=(jax.ShapeDtypeStruct((n, l, cout), jnp.float32),
                   jax.ShapeDtypeStruct((n, 8, cout), jnp.float32)),
        grid=(n,),
        in_specs=[
            pl.BlockSpec((1, l, cin), lambda i: (i, 0, 0)),
            pl.BlockSpec((1, cin), lambda i: (0, 0)),
            pl.BlockSpec((1, cin), lambda i: (0, 0)),
            pl.BlockSpec((3 * cin, cout), lambda i: (0, 0)),
            pl.BlockSpec((1, cout), lambda i: (0, 0)),
        ],
        out_specs=(pl.BlockSpec((1, l, cout), lambda i: (i, 0, 0)),
                   pl.BlockSpec((1, 8, cout), lambda i: (i, 0, 0))),
        compiler_params=cp,
    )(x, sc1, sh1, w1s, params["conv1_b"])

    # --- BN2 batch statistics from the per-tile partials ------------------
    cnt = n * l
    mean2 = jnp.sum(stats[:, 0, :], axis=0) / cnt
    var2 = jnp.maximum(jnp.sum(stats[:, 1, :], axis=0) / cnt - mean2 ** 2, 0.0)
    sc2, sh2 = _bn_scale_shift(mean2, var2,
                               params["bn2_gamma"][0], params["bn2_beta"][0])
    sc2 = sc2.reshape(1, cout)
    sh2 = sh2.reshape(1, cout)

    # --- stage 2: rest of the block, per-sample tiles ----------------------
    out_nlc = pl.pallas_call(
        _stage2_kernel,
        out_shape=jax.ShapeDtypeStruct((n, lp, cout), jnp.float32),
        grid=(n,),
        in_specs=[
            pl.BlockSpec((1, l, cout), lambda i: (i, 0, 0)),
            pl.BlockSpec((1, l, cin), lambda i: (i, 0, 0)),
            pl.BlockSpec((1, cout), lambda i: (0, 0)),
            pl.BlockSpec((1, cout), lambda i: (0, 0)),
            pl.BlockSpec((3 * cout, cout), lambda i: (0, 0)),
            pl.BlockSpec((1, cout), lambda i: (0, 0)),
            pl.BlockSpec((cin, cout), lambda i: (0, 0)),
            pl.BlockSpec((1, cout), lambda i: (0, 0)),
            pl.BlockSpec((cout, cout), lambda i: (0, 0)),
            pl.BlockSpec((1, cout), lambda i: (0, 0)),
        ],
        out_specs=pl.BlockSpec((1, lp, cout), lambda i: (i, 0, 0)),
        scratch_shapes=[pltpu.VMEM((l, cout), jnp.float32)],
        compiler_params=cp,
    )(h1, x, sc2, sh2, w2s, params["conv2_b"], wr, params["resize_b"],
      wf, params["fms_b"])

    return jnp.transpose(out_nlc, (0, 2, 1))                   # NLC -> NCL


# ---------------------------------------------------------------------------
# pure-JAX reference (same math; mirrors the bf16 matmul-operand policy)
# ---------------------------------------------------------------------------
def resblock_ref(x_ncl, p):
    x = jnp.transpose(x_ncl, (0, 2, 1)).astype(jnp.float32)
    n, l, cin = x.shape
    cout = p["conv1_w"].shape[-1]
    w1s = p["conv1_w"].reshape(3 * cin, cout).astype(MM_DTYPE)
    w2s = p["conv2_w"].reshape(3 * cout, cout).astype(MM_DTYPE)

    def bn(h, gamma, beta):
        mean = jnp.mean(h, axis=(0, 1), keepdims=True)
        var = jnp.mean((h - mean) ** 2, axis=(0, 1), keepdims=True)
        return (h - mean) * jax.lax.rsqrt(var + EPS) * gamma + beta

    def conv3(h, ws, b):
        zeros = jnp.zeros_like(h[:, :1, :])
        h_m1 = jnp.concatenate([zeros, h[:, :-1, :]], axis=1)
        h_p1 = jnp.concatenate([h[:, 1:, :], zeros], axis=1)
        lhs = jnp.concatenate([h_m1, h, h_p1], axis=-1).astype(MM_DTYPE)
        nn_, ll_, c3 = lhs.shape
        out = jnp.dot(lhs.reshape(nn_ * ll_, c3), ws,
                      preferred_element_type=jnp.float32)
        return out.reshape(nn_, ll_, -1) + b

    h = jnp.maximum(bn(x, p["bn1_gamma"], p["bn1_beta"]), 0.0)
    h = conv3(h, w1s, p["conv1_b"])
    h = bn(h, p["bn2_gamma"], p["bn2_beta"])
    h = jnp.where(h > 0, h, LEAKY_SLOPE * h)
    h = conv3(h, w2s, p["conv2_b"])
    xr = jnp.dot(x.reshape(n * l, cin).astype(MM_DTYPE),
                 p["resize_w"].astype(MM_DTYPE),
                 preferred_element_type=jnp.float32).reshape(n, l, -1) + p["resize_b"]
    h = h + xr
    lp = l // 3
    pooled = jnp.max(h[:, :lp * 3, :].reshape(n, lp, 3, -1), axis=2)
    avg = jnp.mean(pooled, axis=1)
    gate = jax.nn.sigmoid(jnp.dot(avg.astype(MM_DTYPE),
                                  p["fms_w"].astype(MM_DTYPE),
                                  preferred_element_type=jnp.float32) + p["fms_b"])
    gate = gate[:, None, :]
    return jnp.transpose(gate * pooled + gate, (0, 2, 1))


if __name__ == "__main__":
    N, CIN, COUT, L = 2, 4, 8, 24
    key = jax.random.PRNGKey(0)
    kx, kp = jax.random.split(key)

    x = jax.random.normal(kx, (N, CIN, L), dtype=jnp.float32)   # PyTorch NCL input
    params = init_params(kp, CIN, COUT)

    out = jax.jit(resblock_forward)(x, params)
    out = jax.block_until_ready(out)

    assert out.shape == (N, COUT, L // 3), out.shape
    ref = resblock_ref(x, params)
    np.testing.assert_allclose(np.asarray(out), np.asarray(ref),
                               rtol=2e-3, atol=2e-3)

    print("KERNEL_OK")
</pallas_src>

<mosaic_0001>
module attributes {stable_mosaic.version = 11 : i64} {
  func.func @_stage1_kernel(%arg0: i32, %arg1: memref<1x24x4xf32, #tpu.memory_space<vmem>>, %arg2: memref<1x4xf32, #tpu.memory_space<vmem>>, %arg3: memref<1x4xf32, #tpu.memory_space<vmem>>, %arg4: memref<12x8xbf16, #tpu.memory_space<vmem>>, %arg5: memref<1x8xf32, #tpu.memory_space<vmem>>, %arg6: memref<1x24x8xf32, #tpu.memory_space<vmem>>, %arg7: memref<1x8x8xf32, #tpu.memory_space<vmem>>) attributes {dimension_semantics = [#tpu.dimension_semantics<parallel>], iteration_bounds = array<i64: 2>, scalar_prefetch = 0 : i64, scratch_operands = 0 : i64, tpu.core_type = #tpu.core_type<tc>, window_params = [{transform_indices = @transform_0, window_bounds = array<i64: 1, 24, 4>}, {pipeline_mode = #tpu.pipeline_mode<synchronous>, transform_indices = @transform_1, window_bounds = array<i64: 1, 4>}, {pipeline_mode = #tpu.pipeline_mode<synchronous>, transform_indices = @transform_2, window_bounds = array<i64: 1, 4>}, {pipeline_mode = #tpu.pipeline_mode<synchronous>, transform_indices = @transform_3, window_bounds = array<i64: 12, 8>}, {pipeline_mode = #tpu.pipeline_mode<synchronous>, transform_indices = @transform_4, window_bounds = array<i64: 1, 8>}, {transform_indices = @transform_5, window_bounds = array<i64: 1, 24, 8>}, {transform_indices = @transform_6, window_bounds = array<i64: 1, 8, 8>}]} {
    %c0 = arith.constant 0 : index
    %c0_0 = arith.constant 0 : index
    %c0_1 = arith.constant 0 : index
    %0 = vector.load %arg1[%c0, %c0_0, %c0_1] : memref<1x24x4xf32, #tpu.memory_space<vmem>>, vector<1x24x4xf32>
    %1 = vector.shape_cast %0 : vector<1x24x4xf32> to vector<24x4xf32>
    %c0_2 = arith.constant 0 : index
    %c0_3 = arith.constant 0 : index
    %2 = vector.load %arg2[%c0_2, %c0_3] : memref<1x4xf32, #tpu.memory_space<vmem>>, vector<1x4xf32>
    %3 = vector.broadcast %2 : vector<1x4xf32> to vector<24x4xf32>
    %4 = arith.mulf %1, %3 : vector<24x4xf32>
    %c0_4 = arith.constant 0 : index
    %c0_5 = arith.constant 0 : index
    %5 = vector.load %arg3[%c0_4, %c0_5] : memref<1x4xf32, #tpu.memory_space<vmem>>, vector<1x4xf32>
    %6 = vector.broadcast %5 : vector<1x4xf32> to vector<24x4xf32>
    %7 = arith.addf %4, %6 : vector<24x4xf32>
    %cst = arith.constant 0.000000e+00 : f32
    %8 = vector.broadcast %cst : f32 to vector<24x4xf32>
    %9 = arith.maximumf %7, %8 : vector<24x4xf32>
    %10 = tpu.iota {dimensions = array<i32: 0>} : vector<24x4xi32>
    %c0_i32 = arith.constant 0 : i32
    %11 = vector.broadcast %c0_i32 : i32 to vector<24x4xi32>
    %12 = arith.cmpi eq, %10, %11 : vector<24x4xi32>
    %c1_i32 = arith.constant 1 : i32
    %13 = tpu.dynamic_rotate %9 by %c1_i32 dim 0 : vector<24x4xf32>, i32 -> vector<24x4xf32>
    %cst_6 = arith.constant 0.000000e+00 : f32
    %14 = vector.broadcast %cst_6 : f32 to vector<24x4xf32>
    %15 = arith.select %12, %14, %13 : vector<24x4xi1>, vector<24x4xf32>
    %c23_i32 = arith.constant 23 : i32
    %16 = vector.broadcast %c23_i32 : i32 to vector<24x4xi32>
    %17 = arith.cmpi eq, %10, %16 : vector<24x4xi32>
    %c23_i32_7 = arith.constant 23 : i32
    %18 = tpu.dynamic_rotate %9 by %c23_i32_7 dim 0 : vector<24x4xf32>, i32 -> vector<24x4xf32>
    %cst_8 = arith.constant 0.000000e+00 : f32
    %19 = vector.broadcast %cst_8 : f32 to vector<24x4xf32>
    %20 = arith.select %17, %19, %18 : vector<24x4xi1>, vector<24x4xf32>
    %21 = tpu.concatenate %15, %9, %20 in 1 : vector<24x4xf32>, vector<24x4xf32>, vector<24x4xf32> -> vector<24x12xf32>
    %22 = arith.truncf %21 : vector<24x12xf32> to vector<24x12xbf16>
    %c0_9 = arith.constant 0 : index
    %c0_10 = arith.constant 0 : index
    %23 = vector.load %arg4[%c0_9, %c0_10] : memref<12x8xbf16, #tpu.memory_space<vmem>>, vector<12x8xbf16>
    %cst_11 = arith.constant dense<0.000000e+00> : vector<24x8xf32>
    %24 = tpu.matmul %22, %23, %cst_11 {dimension_numbers = #tpu.dot_dimension_numbers<[1], [0], [0], [1], [0, 0, 1, 1], [], []>} : vector<24x12xbf16>, vector<12x8xbf16>, vector<24x8xf32> -> vector<24x8xf32>
    %c0_12 = arith.constant 0 : index
    %c0_13 = arith.constant 0 : index
    %25 = vector.load %arg5[%c0_12, %c0_13] : memref<1x8xf32, #tpu.memory_space<vmem>>, vector<1x8xf32>
    %26 = vector.broadcast %25 : vector<1x8xf32> to vector<24x8xf32>
    %27 = arith.addf %24, %26 : vector<24x8xf32>
    %c0_14 = arith.constant 0 : index
    %c0_15 = arith.constant 0 : index
    %c0_16 = arith.constant 0 : index
    %28 = vector.load %arg6[%c0_14, %c0_15, %c0_16] : memref<1x24x8xf32, #tpu.memory_space<vmem>>, vector<1x24x8xf32>
    %29 = vector.shape_cast %28 : vector<1x24x8xf32> to vector<24x8xf32>
    %30 = vector.shape_cast %27 : vector<24x8xf32> to vector<1x24x8xf32>
    tpu.vector_store %arg6[%c0_14, %c0_15, %c0_16], %30 {strides = array<i32>} : memref<1x24x8xf32, #tpu.memory_space<vmem>>, vector<1x24x8xf32>,
    %cst_17 = arith.constant dense<0.000000e+00> : vector<8xf32>
    %31 = vector.multi_reduction <add>, %27, %cst_17 [0] : vector<24x8xf32> to vector<8xf32>
    %32 = vector.shape_cast %31 : vector<8xf32> to vector<1x8xf32>
    %33 = arith.mulf %27, %27 : vector<24x8xf32>
    %cst_18 = arith.constant dense<0.000000e+00> : vector<8xf32>
    %34 = vector.multi_reduction <add>, %33, %cst_18 [0] : vector<24x8xf32> to vector<8xf32>
    %35 = vector.shape_cast %34 : vector<8xf32> to vector<1x8xf32>
    %36 = tpu.iota {dimensions = array<i32: 0>} : vector<8x8xi32>
    %c0_i32_19 = arith.constant 0 : i32
    %37 = vector.broadcast %c0_i32_19 : i32 to vector<8x8xi32>
    %38 = arith.cmpi eq, %36, %37 : vector<8x8xi32>
    %c1_i32_20 = arith.constant 1 : i32
    %39 = vector.broadcast %c1_i32_20 : i32 to vector<8x8xi32>
    %40 = arith.cmpi eq, %36, %39 : vector<8x8xi32>
    %cst_21 = arith.constant 0.000000e+00 : f32
    %41 = vector.shape_cast %35 : vector<1x8xf32> to vector<1x8xf32>
    %42 = vector.broadcast %41 : vector<1x8xf32> to vector<8x8xf32>
    %43 = vector.broadcast %cst_21 : f32 to vector<8x8xf32>
    %44 = arith.select %40, %42, %43 : vector<8x8xi1>, vector<8x8xf32>
    %45 = vector.shape_cast %32 : vector<1x8xf32> to vector<1x8xf32>
    %46 = vector.broadcast %45 : vector<1x8xf32> to vector<8x8xf32>
    %47 = arith.select %38, %46, %44 : vector<8x8xi1>, vector<8x8xf32>
    %c0_22 = arith.constant 0 : index
    %c0_23 = arith.constant 0 : index
    %c0_24 = arith.constant 0 : index
    %48 = vector.load %arg7[%c0_22, %c0_23, %c0_24] : memref<1x8x8xf32, #tpu.memory_space<vmem>>, vector<1x8x8xf32>
    %49 = vector.shape_cast %48 : vector<1x8x8xf32> to vector<8x8xf32>
    %50 = vector.shape_cast %47 : vector<8x8xf32> to vector<1x8x8xf32>
    tpu.vector_store %arg7[%c0_22, %c0_23, %c0_24], %50 {strides = array<i32>} : memref<1x8x8xf32, #tpu.memory_space<vmem>>, vector<1x8x8xf32>,
    return
  }
  func.func @transform_0(%arg0: i32) -> (i32, i32, i32) {
    %c0_i32 = arith.constant 0 : i32
    %c0_i32_0 = arith.constant 0 : i32
    %c0_i32_1 = arith.constant 0 : i32
    return %arg0, %c0_i32, %c0_i32_0 : i32, i32, i32
  }
  func.func @transform_1(%arg0: i32) -> (i32, i32) {
    %c0_i32 = arith.constant 0 : i32
    %c0_i32_0 = arith.constant 0 : i32
    %c0_i32_1 = arith.constant 0 : i32
    return %c0_i32, %c0_i32_0 : i32, i32
  }
  func.func @transform_2(%arg0: i32) -> (i32, i32) {
    %c0_i32 = arith.constant 0 : i32
    %c0_i32_0 = arith.constant 0 : i32
    %c0_i32_1 = arith.constant 0 : i32
    return %c0_i32, %c0_i32_0 : i32, i32
  }
  func.func @transform_3(%arg0: i32) -> (i32, i32) {
    %c0_i32 = arith.constant 0 : i32
    %c0_i32_0 = arith.constant 0 : i32
    %c0_i32_1 = arith.constant 0 : i32
    return %c0_i32, %c0_i32_0 : i32, i32
  }
  func.func @transform_4(%arg0: i32) -> (i32, i32) {
    %c0_i32 = arith.constant 0 : i32
    %c0_i32_0 = arith.constant 0 : i32
    %c0_i32_1 = arith.constant 0 : i32
    return %c0_i32, %c0_i32_0 : i32, i32
  }
  func.func @transform_5(%arg0: i32) -> (i32, i32, i32) {
    %c0_i32 = arith.constant 0 : i32
    %c0_i32_0 = arith.constant 0 : i32
    %c0_i32_1 = arith.constant 0 : i32
    return %arg0, %c0_i32, %c0_i32_0 : i32, i32, i32
  }
  func.func @transform_6(%arg0: i32) -> (i32, i32, i32) {
    %c0_i32 = arith.constant 0 : i32
    %c0_i32_0 = arith.constant 0 : i32
    %c0_i32_1 = arith.constant 0 : i32
    return %arg0, %c0_i32, %c0_i32_0 : i32, i32, i32
  }
}

module attributes {stable_mosaic.version = 11 : i64} {
  func.func @_stage2_kernel(%arg0: i32, %arg1: memref<1x24x8xf32, #tpu.memory_space<vmem>>, %arg2: memref<1x24x4xf32, #tpu.memory_space<vmem>>, %arg3: memref<1x8xf32, #tpu.memory_space<vmem>>, %arg4: memref<1x8xf32, #tpu.memory_space<vmem>>, %arg5: memref<24x8xbf16, #tpu.memory_space<vmem>>, %arg6: memref<1x8xf32, #tpu.memory_space<vmem>>, %arg7: memref<4x8xbf16, #tpu.memory_space<vmem>>, %arg8: memref<1x8xf32, #tpu.memory_space<vmem>>, %arg9: memref<8x8xbf16, #tpu.memory_space<vmem>>, %arg10: memref<1x8xf32, #tpu.memory_space<vmem>>, %arg11: memref<1x8x8xf32, #tpu.memory_space<vmem>>, %arg12: memref<24x8xf32, #tpu.memory_space<vmem>>) attributes {dimension_semantics = [#tpu.dimension_semantics<parallel>], iteration_bounds = array<i64: 2>, scalar_prefetch = 0 : i64, scratch_operands = 1 : i64, tpu.core_type = #tpu.core_type<tc>, window_params = [{transform_indices = @transform_0, window_bounds = array<i64: 1, 24, 8>}, {transform_indices = @transform_1, window_bounds = array<i64: 1, 24, 4>}, {pipeline_mode = #tpu.pipeline_mode<synchronous>, transform_indices = @transform_2, window_bounds = array<i64: 1, 8>}, {pipeline_mode = #tpu.pipeline_mode<synchronous>, transform_indices = @transform_3, window_bounds = array<i64: 1, 8>}, {pipeline_mode = #tpu.pipeline_mode<synchronous>, transform_indices = @transform_4, window_bounds = array<i64: 24, 8>}, {pipeline_mode = #tpu.pipeline_mode<synchronous>, transform_indices = @transform_5, window_bounds = array<i64: 1, 8>}, {pipeline_mode = #tpu.pipeline_mode<synchronous>, transform_indices = @transform_6, window_bounds = array<i64: 4, 8>}, {pipeline_mode = #tpu.pipeline_mode<synchronous>, transform_indices = @transform_7, window_bounds = array<i64: 1, 8>}, {pipeline_mode = #tpu.pipeline_mode<synchronous>, transform_indices = @transform_8, window_bounds = array<i64: 8, 8>}, {pipeline_mode = #tpu.pipeline_mode<synchronous>, transform_indices = @transform_9, window_bounds = array<i64: 1, 8>}, {transform_indices = @transform_10, window_bounds = array<i64: 1, 8, 8>}]} {
    %c0 = arith.constant 0 : index
    %c0_0 = arith.constant 0 : index
    %c0_1 = arith.constant 0 : index
    %0 = vector.load %arg1[%c0, %c0_0, %c0_1] : memref<1x24x8xf32, #tpu.memory_space<vmem>>, vector<1x24x8xf32>
    %1 = vector.shape_cast %0 : vector<1x24x8xf32> to vector<24x8xf32>
    %c0_2 = arith.constant 0 : index
    %c0_3 = arith.constant 0 : index
    %c0_4 = arith.constant 0 : index
    %2 = vector.load %arg2[%c0_2, %c0_3, %c0_4] : memref<1x24x4xf32, #tpu.memory_space<vmem>>, vector<1x24x4xf32>
    %3 = vector.shape_cast %2 : vector<1x24x4xf32> to vector<24x4xf32>
    %c0_5 = arith.constant 0 : index
    %c0_6 = arith.constant 0 : index
    %4 = vector.load %arg3[%c0_5, %c0_6] : memref<1x8xf32, #tpu.memory_space<vmem>>, vector<1x8xf32>
    %5 = vector.broadcast %4 : vector<1x8xf32> to vector<24x8xf32>
    %6 = arith.mulf %1, %5 : vector<24x8xf32>
    %c0_7 = arith.constant 0 : index
    %c0_8 = arith.constant 0 : index
    %7 = vector.load %arg4[%c0_7, %c0_8] : memref<1x8xf32, #tpu.memory_space<vmem>>, vector<1x8xf32>
    %8 = vector.broadcast %7 : vector<1x8xf32> to vector<24x8xf32>
    %9 = arith.addf %6, %8 : vector<24x8xf32>
    %cst = arith.constant 0.000000e+00 : f32
    %10 = vector.broadcast %cst : f32 to vector<24x8xf32>
    %11 = arith.cmpf ogt, %9, %10 : vector<24x8xf32>
    %cst_9 = arith.constant 3.000000e-01 : f32
    %12 = vector.broadcast %cst_9 : f32 to vector<24x8xf32>
    %13 = arith.mulf %12, %9 : vector<24x8xf32>
    %14 = arith.select %11, %9, %13 : vector<24x8xi1>, vector<24x8xf32>
    %15 = tpu.iota {dimensions = array<i32: 0>} : vector<24x8xi32>
    %c0_i32 = arith.constant 0 : i32
    %16 = vector.broadcast %c0_i32 : i32 to vector<24x8xi32>
    %17 = arith.cmpi eq, %15, %16 : vector<24x8xi32>
    %c1_i32 = arith.constant 1 : i32
    %18 = tpu.dynamic_rotate %14 by %c1_i32 dim 0 : vector<24x8xf32>, i32 -> vector<24x8xf32>
    %cst_10 = arith.constant 0.000000e+00 : f32
    %19 = vector.broadcast %cst_10 : f32 to vector<24x8xf32>
    %20 = arith.select %17, %19, %18 : vector<24x8xi1>, vector<24x8xf32>
    %c23_i32 = arith.constant 23 : i32
    %21 = vector.broadcast %c23_i32 : i32 to vector<24x8xi32>
    %22 = arith.cmpi eq, %15, %21 : vector<24x8xi32>
    %c23_i32_11 = arith.constant 23 : i32
    %23 = tpu.dynamic_rotate %14 by %c23_i32_11 dim 0 : vector<24x8xf32>, i32 -> vector<24x8xf32>
    %cst_12 = arith.constant 0.000000e+00 : f32
    %24 = vector.broadcast %cst_12 : f32 to vector<24x8xf32>
    %25 = arith.select %22, %24, %23 : vector<24x8xi1>, vector<24x8xf32>
    %26 = tpu.concatenate %20, %14, %25 in 1 : vector<24x8xf32>, vector<24x8xf32>, vector<24x8xf32> -> vector<24x24xf32>
    %27 = arith.truncf %26 : vector<24x24xf32> to vector<24x24xbf16>
    %c0_13 = arith.constant 0 : index
    %c0_14 = arith.constant 0 : index
    %28 = vector.load %arg5[%c0_13, %c0_14] : memref<24x8xbf16, #tpu.memory_space<vmem>>, vector<24x8xbf16>
    %cst_15 = arith.constant dense<0.000000e+00> : vector<24x8xf32>
    %29 = tpu.matmul %27, %28, %cst_15 {dimension_numbers = #tpu.dot_dimension_numbers<[1], [0], [0], [1], [0, 0, 1, 1], [], []>} : vector<24x24xbf16>, vector<24x8xbf16>, vector<24x8xf32> -> vector<24x8xf32>
    %c0_16 = arith.constant 0 : index
    %c0_17 = arith.constant 0 : index
    %30 = vector.load %arg6[%c0_16, %c0_17] : memref<1x8xf32, #tpu.memory_space<vmem>>, vector<1x8xf32>
    %31 = vector.broadcast %30 : vector<1x8xf32> to vector<24x8xf32>
    %32 = arith.addf %29, %31 : vector<24x8xf32>
    %33 = arith.truncf %3 : vector<24x4xf32> to vector<24x4xbf16>
    %c0_18 = arith.constant 0 : index
    %c0_19 = arith.constant 0 : index
    %34 = vector.load %arg7[%c0_18, %c0_19] : memref<4x8xbf16, #tpu.memory_space<vmem>>, vector<4x8xbf16>
    %cst_20 = arith.constant dense<0.000000e+00> : vector<24x8xf32>
    %35 = tpu.matmul %33, %34, %cst_20 {dimension_numbers = #tpu.dot_dimension_numbers<[1], [0], [0], [1], [0, 0, 1, 1], [], []>} : vector<24x4xbf16>, vector<4x8xbf16>, vector<24x8xf32> -> vector<24x8xf32>
    %c0_21 = arith.constant 0 : index
    %c0_22 = arith.constant 0 : index
    %36 = vector.load %arg8[%c0_21, %c0_22] : memref<1x8xf32, #tpu.memory_space<vmem>>, vector<1x8xf32>
    %37 = vector.broadcast %36 : vector<1x8xf32> to vector<24x8xf32>
    %38 = arith.addf %35, %37 : vector<24x8xf32>
    %39 = arith.addf %32, %38 : vector<24x8xf32>
    %c0_23 = arith.constant 0 : index
    %c0_24 = arith.constant 0 : index
    %40 = vector.load %arg12[%c0_23, %c0_24] : memref<24x8xf32, #tpu.memory_space<vmem>>, vector<24x8xf32>
    tpu.vector_store %arg12[%c0_23, %c0_24], %39 {strides = array<i32>} : memref<24x8xf32, #tpu.memory_space<vmem>>, vector<24x8xf32>,
    %c0_25 = arith.constant 0 : index
    %c0_26 = arith.constant 0 : index
    %41 = tpu.strided_load %arg12[%c0_25, %c0_26] {strides = array<i32: 3, 1>} : memref<24x8xf32, #tpu.memory_space<vmem>>, vector<8x8xf32>
    %c1 = arith.constant 1 : index
    %c0_27 = arith.constant 0 : index
    %42 = tpu.strided_load %arg12[%c1, %c0_27] {strides = array<i32: 3, 1>} : memref<24x8xf32, #tpu.memory_space<vmem>>, vector<8x8xf32>
    %c2 = arith.constant 2 : index
    %c0_28 = arith.constant 0 : index
    %43 = tpu.strided_load %arg12[%c2, %c0_28] {strides = array<i32: 3, 1>} : memref<24x8xf32, #tpu.memory_space<vmem>>, vector<8x8xf32>
    %44 = arith.maximumf %41, %42 : vector<8x8xf32>
    %45 = arith.maximumf %44, %43 : vector<8x8xf32>
    %cst_29 = arith.constant dense<0.000000e+00> : vector<8xf32>
    %46 = vector.multi_reduction <add>, %45, %cst_29 [0] : vector<8x8xf32> to vector<8xf32>
    %47 = vector.shape_cast %46 : vector<8xf32> to vector<1x8xf32>
    %cst_30 = arith.constant 8.000000e+00 : f32
    %48 = vector.broadcast %cst_30 : f32 to vector<1x8xf32>
    %49 = arith.divf %47, %48 : vector<1x8xf32>
    %50 = arith.truncf %49 : vector<1x8xf32> to vector<1x8xbf16>
    %c0_31 = arith.constant 0 : index
    %c0_32 = arith.constant 0 : index
    %51 = vector.load %arg9[%c0_31, %c0_32] : memref<8x8xbf16, #tpu.memory_space<vmem>>, vector<8x8xbf16>
    %cst_33 = arith.constant dense<0.000000e+00> : vector<1x8xf32>
    %52 = tpu.matmul %50, %51, %cst_33 {dimension_numbers = #tpu.dot_dimension_numbers<[1], [0], [0], [1], [0, 0, 1, 1], [], []>} : vector<1x8xbf16>, vector<8x8xbf16>, vector<1x8xf32> -> vector<1x8xf32>
    %c0_34 = arith.constant 0 : index
    %c0_35 = arith.constant 0 : index
    %53 = vector.load %arg10[%c0_34, %c0_35] : memref<1x8xf32, #tpu.memory_space<vmem>>, vector<1x8xf32>
    %54 = arith.addf %52, %53 : vector<1x8xf32>
    %55 = arith.negf %54 : vector<1x8xf32>
    %56 = math.exp %55 : vector<1x8xf32>
    %cst_36 = arith.constant 1.000000e+00 : f32
    %57 = vector.broadcast %cst_36 : f32 to vector<1x8xf32>
    %58 = arith.addf %57, %56 : vector<1x8xf32>
    %59 = arith.divf %57, %58 : vector<1x8xf32>
    %60 = vector.broadcast %59 : vector<1x8xf32> to vector<8x8xf32>
    %61 = arith.mulf %60, %45 : vector<8x8xf32>
    %62 = vector.broadcast %59 : vector<1x8xf32> to vector<8x8xf32>
    %63 = arith.addf %61, %62 : vector<8x8xf32>
    %c0_37 = arith.constant 0 : index
    %c0_38 = arith.constant 0 : index
    %c0_39 = arith.constant 0 : index
    %64 = vector.load %arg11[%c0_37, %c0_38, %c0_39] : memref<1x8x8xf32, #tpu.memory_space<vmem>>, vector<1x8x8xf32>
    %65 = vector.shape_cast %64 : vector<1x8x8xf32> to vector<8x8xf32>
    %66 = vector.shape_cast %63 : vector<8x8xf32> to vector<1x8x8xf32>
    tpu.vector_store %arg11[%c0_37, %c0_38, %c0_39], %66 {strides = array<i32>} : memref<1x8x8xf32, #tpu.memory_space<vmem>>, vector<1x8x8xf32>,
    return
  }
  func.func @transform_0(%arg0: i32) -> (i32, i32, i32) {
    %c0_i32 = arith.constant 0 : i32
    %c0_i32_0 = arith.constant 0 : i32
    %c0_i32_1 = arith.constant 0 : i32
    return %arg0, %c0_i32, %c0_i32_0 : i32, i32, i32
  }
  func.func @transform_1(%arg0: i32) -> (i32, i32, i32) {
    %c0_i32 = arith.constant 0 : i32
    %c0_i32_0 = arith.constant 0 : i32
    %c0_i32_1 = arith.constant 0 : i32
    return %arg0, %c0_i32, %c0_i32_0 : i32, i32, i32
  }
  func.func @transform_2(%arg0: i32) -> (i32, i32) {
    %c0_i32 = arith.constant 0 : i32
    %c0_i32_0 = arith.constant 0 : i32
    %c0_i32_1 = arith.constant 0 : i32
    return %c0_i32, %c0_i32_0 : i32, i32
  }
  func.func @transform_3(%arg0: i32) -> (i32, i32) {
    %c0_i32 = arith.constant 0 : i32
    %c0_i32_0 = arith.constant 0 : i32
    %c0_i32_1 = arith.constant 0 : i32
    return %c0_i32, %c0_i32_0 : i32, i32
  }
  func.func @transform_4(%arg0: i32) -> (i32, i32) {
    %c0_i32 = arith.constant 0 : i32
    %c0_i32_0 = arith.constant 0 : i32
    %c0_i32_1 = arith.constant 0 : i32
    return %c0_i32, %c0_i32_0 : i32, i32
  }
  func.func @transform_5(%arg0: i32) -> (i32, i32) {
    %c0_i32 = arith.constant 0 : i32
    %c0_i32_0 = arith.constant 0 : i32
    %c0_i32_1 = arith.constant 0 : i32
    return %c0_i32, %c0_i32_0 : i32, i32
  }
  func.func @transform_6(%arg0: i32) -> (i32, i32) {
    %c0_i32 = arith.constant 0 : i32
    %c0_i32_0 = arith.constant 0 : i32
    %c0_i32_1 = arith.constant 0 : i32
    return %c0_i32, %c0_i32_0 : i32, i32
  }
  func.func @transform_7(%arg0: i32) -> (i32, i32) {
    %c0_i32 = arith.constant 0 : i32
    %c0_i32_0 = arith.constant 0 : i32
    %c0_i32_1 = arith.constant 0 : i32
    return %c0_i32, %c0_i32_0 : i32, i32
  }
  func.func @transform_8(%arg0: i32) -> (i32, i32) {
    %c0_i32 = arith.constant 0 : i32
    %c0_i32_0 = arith.constant 0 : i32
    %c0_i32_1 = arith.constant 0 : i32
    return %c0_i32, %c0_i32_0 : i32, i32
  }
  func.func @transform_9(%arg0: i32) -> (i32, i32) {
    %c0_i32 = arith.constant 0 : i32
    %c0_i32_0 = arith.constant 0 : i32
    %c0_i32_1 = arith.constant 0 : i32
    return %c0_i32, %c0_i32_0 : i32, i32
  }
  func.func @transform_10(%arg0: i32) -> (i32, i32, i32) {
    %c0_i32 = arith.constant 0 : i32
    %c0_i32_0 = arith.constant 0 : i32
    %c0_i32_1 = arith.constant 0 : i32
    return %arg0, %c0_i32, %c0_i32_0 : i32, i32, i32
  }
}

</mosaic_0001>

<bundles_post_ra>
// kernel: resblock_forward.3
= control target key start
LH: loop header
LB: loop body
LE: loop exit
PB: predicated region body
PF: predicated region fallthrough
CT: control target
= control target key end

     0   :  { %s932_s13 = smov 0   ;;  %s1015_s0 = inlined_call_operand.vmem [shape: f32[2,24,8], index: 0, kind: input, shape index: {}]   ;;  %s1016_s1 = inlined_call_operand.vmem [shape: f32[2,24,4], index: 1, kind: input, shape index: {}]   ;;  %s1017_s2 = inlined_call_operand.vmem [shape: f32[1,8], index: 2, kind: input, shape index: {}]   ;;  %s1018_s3 = inlined_call_operand.vmem [shape: f32[1,8], index: 3, kind: input, shape index: {}]   ;;  %s1019_s4 = inlined_call_operand.vmem [shape: bf16[24,8], index: 4, kind: input, shape index: {}]   ;;  %s1020_s5 = inlined_call_operand.vmem [shape: f32[1,8], index: 5, kind: input, shape index: {}]   ;;  %s1021_s6 = inlined_call_operand.vmem [shape: bf16[4,8], index: 6, kind: input, shape index: {}]   ;;  %s1022_s7 = inlined_call_operand.vmem [shape: f32[1,8], index: 7, kind: input, shape index: {}]   ;;  %s1023_s8 = inlined_call_operand.vmem [shape: bf16[8,8], index: 8, kind: input, shape index: {}]   ;;  %s1024_s9 = inlined_call_operand.vmem [shape: f32[1,8], index: 9, kind: input, shape index: {}]   ;;  %s1025_s10 = inlined_call_operand.vmem [shape: f32[2,8,8], index: 10, kind: output, shape index: {}]  }
   0x1 LB: > { %s774_s14 = sadd.s32 4294967295, %s871_s13   ;;  %p778_p0 = scmp.ge.s32.totalorder %s871_s13, 1  ;;  %s871_s13 = sphi %s932_s13, %s20_s13  }
   0x2   : > { %p322_p1 = scmp.lt.s32.totalorder %s871_s13, 3 }
   0x4   : > { %p323_p2 = pnand %p778_p0, %p322_p1 }
   0x5   : > { %p364_p3 = scmp.lt.s32.totalorder (!%p323_p2), %s774_s14, 1  ;;  %v414_v0 = vlaneseq (!%p323_p2)  ;;  %v859_v1 = vld [vmem:[%s1019_s4] sm:$0xff] (!%p323_p2)   ;;  %v860_v11 = vld [vmem:[%s1019_s4 + $0x8] ss:$0 sps:$4 sm:$0xff] (!%p323_p2)   ;;  %vm504_vm0 = vcmask (!%p323_p2), 1043456   ;;  %vm573_vm6 = vcmask (!%p323_p2), 1041408  }
   0x6   : > { %326 = sbr.rel (%p323_p2) target bundleno = 651 (0x28b), region = 60  ;;  %v782_v2 = vld [vmem:[%s1017_s2] ss:$0 sm:$0xff] (!%p323_p2)  ;;  %805 = vmatprep.subr.bf16.mxu0 (!%p323_p2), %v859_v1  ;;  %v506_v19 = vsel (!%p323_p2), %vm504_vm0, %v860_v11, 0  ;;  %s873_s12 = smov (!%p323_p2), 8   ;;  %vm566_vm7 = vcmask (!%p323_p2), 31744  }
   0x7   : > { %v783_v3 = vld [vmem:[%s1018_s3] ss:$0 sm:$0xff] (!%p323_p2)  ;;  %v955_v7 = vshrl.u32 (!%p323_p2), %v414_v0, 7  ;;  %806 = vmatpush3.bf16.msra.mxu0 (!%p323_p2), %v859_v1  ;;  %vm468_vm10 = vcmask (!%p323_p2), 64512   ;;  %vm472_vm11 = vcmask (!%p323_p2), 130048   ;;  %vm497_vm12 = vcmask (!%p323_p2), 195584  }
   0x8   : > { %834 = vmatprep.subr.msk.bf16.mxu0 (!%p323_p2), %vm504_vm0, %v860_v11  ;;  %v558_v20 = vld [vmem:[%s1021_s6] sm:$0x3] (!%p323_p2)  ;;  %vm876_vm13 = vmmov (!%p323_p2), 0  }
   0x9   : > { %vm437_vm1 = vcmp.lt.s32.totalorder (!%p323_p2), %v955_v7, 7  ;;  %v417_v15 = vadd.s32 (!%p323_p2), 16, %v955_v7  ;;  %vm424_vm5 = vcmp.lt.s32.totalorder (!%p323_p2), %v955_v7, 1  ;;  %835 = vmatprep.subr.msk.bf16.mxu1 (!%p323_p2), %vm573_vm6, %v558_v20  ;;  %v575_v32 = vsel (!%p323_p2), %vm573_vm6, %v558_v20, 0  ;;  %v789_v11 = vld [vmem:[%s1022_s7] ss:$0 sm:$0xff] (!%p323_p2) }
   0xa   : > { %814 = vmatpush3.bf16.msra.mxu1 (!%p323_p2), %v575_v32  ;;  %vm418_vm9 = vcmp.eq.s32.totalorder (!%p323_p2), %v955_v7, 0 }
   0xb   : > { %808 = vmatpush3.bf16.msra.mxu0 (!%p323_p2), %v506_v19  ;;  %vm433_vm8 = vcmp.eq.s32.totalorder (!%p323_p2), %v417_v15, 23 }
   0xd   : > { %s1027_s14 = smov (!%p364_p3, %s774_s14), 1 }
   0xe   : > { %s836_s15 = smul.u32 24, %s1027_s14  ;;  %s781_s24 = sshll.u32 %s1027_s14, 3 }
   0xf   : > { %s377_s27 = scalar_lea.vmem %s1025_s10, %s781_s24 }
  0x10   : > { %s368_s22 = scalar_lea.vmem %s1015_s0, %s836_s15  ;;  %s373_s29 = scalar_lea.vmem %s1016_s1, %s836_s15 }
  0x11   : > { %v379_v4 = vld [vmem:[%s368_s22] sm:$0xff]  ;;  %v380_v5 = vld [vmem:[%s368_s22 + $0x8] sm:$0xff]  ;;  %v381_v6 = vld [vmem:[%s368_s22 + $0x10] sm:$0xff]  ;;  %s874_s15 = smov 16  }
  0x12   : > { %v392_v8 = vmul.f32 %v782_v2, %v379_v4  ;;  %v393_v9 = vmul.f32 %v782_v2, %v380_v5  ;;  %v394_v10 = vmul.f32 %v782_v2, %v381_v6  ;;  %v382_v23 = vld [vmem:[%s373_s29] sm:$0xff]  ;;  %v383_v24 = vld [vmem:[%s373_s29 + $0x8] sm:$0xff]  ;;  %v384_v25 = vld [vmem:[%s373_s29 + $0x10] sm:$0xff] }
  0x13   : > { %v556_v33 = vpack.c.bf16 %v383_v24, %v382_v23  ;;  %v557_v37 = vpack.c.bf16 %v384_v25, %v384_v25  ;;  %v648_v2 = vld [vmem:[%s1023_s8] sm:$0xf] }
  0x14   : > { %v402_v12 = vadd.f32 %v783_v3, %v392_v8  ;;  %v403_v13 = vadd.f32 %v783_v3, %v393_v9  ;;  %v404_v14 = vadd.f32 %v783_v3, %v394_v10  ;;  %v875_v3 = vmov 0.0   ;;  %v784_v5 = vld [vmem:[%s1020_s5] ss:$0 sm:$0xff] }
  0x15   : > { %815 = vmatprep.mubr.msk.bf16.mxu1 %vm566_vm7, %v556_v33  ;;  %819 = vmatprep.subr.bf16.mxu1 %v875_v3  ;;  %v654_v4 = vsel %vm504_vm0, %v648_v2, 0 }
  0x16   : > { %vm405_vm2 = vcmp.gt.f32.partialorder %v402_v12, 0.0  ;;  %vm406_vm3 = vcmp.gt.f32.partialorder %v403_v13, 0.0  ;;  %v408_v16 = vmul.f32 0.3, %v402_v12  ;;  %v409_v17 = vmul.f32 0.3, %v403_v13  ;;  %816 = vmatmul.mubr.msk.bf16.vlgmr.msra.gmra.mrb[0].mxu1 %vm566_vm7, %v557_v37 }
  0x17   : > { %vm407_vm4 = vcmp.gt.f32.partialorder %v404_v14, 0.0  ;;  %v410_v18 = vmul.f32 0.3, %v404_v14  ;;  %821 = vmatprep.mubr.msk.bf16.mxu1 %vm876_vm13, %v875_v3  ;;  %820 = vmatpush3.bf16.msra.mxu1 %v654_v4 }
  0x18   : > { %v411_v21 = vsel %vm405_vm2, %v402_v12, %v408_v16  ;;  %v412_v22 = vsel %vm406_vm3, %v403_v13, %v409_v17 }
  0x19   : > { %v422_v26 = vrot.slane %v412_v22, 7  ;;  %v435_v27 = vrot.slane %v412_v22, 1  ;;  %v849_v28 = vpack.i.bf16 %v412_v22, %v411_v21  ;;  %v421_v29 = vrot.slane %v411_v21, 7 }
  0x1a   : > { %v434_v30 = vrot.slane %v411_v21, 1  ;;  %v413_v31 = vsel %vm407_vm4, %v404_v14, %v410_v18 }
  0x1b   : > { %850 = vrot.lane.b32.xlu0 %v849_v28, %s873_s12  ;;  %v436_v34 = vrot.slane %v413_v31, 1  ;;  %v423_v35 = vrot.slane %v413_v31, 7  ;;  %v426_v36 = vsel %vm424_vm5, %v421_v29, %v422_v26 }
  0x1c   : > { %v439_v38 = vsel %vm437_vm1, %v434_v30, %v435_v27 }
  0x1d   : > { %v438_v39 = vsel %vm437_vm1, %v435_v27, %v436_v34  ;;  %v425_v40 = vsel %vm424_vm5, %v422_v26, %v423_v35  ;;  %v427_v41 = vsel %vm424_vm5, %v423_v35, %v421_v29  ;;  %v440_v43 = vsel %vm437_vm1, %v436_v34, %v434_v30  ;;  %v649_v35 = vld [vmem:[%s1024_s9] sm:$0x1] }
  0x1e   : > { %v854_v42 = vpack.i.bf16 %v438_v39, %v439_v38  ;;  %v443_v44 = vsel %vm433_vm8, 0.0, %v440_v43  ;;  %v428_v48 = vsel %vm418_vm9, 0.0, %v427_v41 }
  0x1f   : > { %451 = vrot.lane.b32.xlu0 %v413_v31, %s873_s12 }
  0x20   : > { %855 = vrot.lane.b32.xlu1 %v854_v42, %s874_s15 }
  0x24   : > { %463 = vrot.lane.b32.xlu1 %v443_v44, %s874_s15  ;;  %v704_v44 = vsub.s32 0, %v955_v7 }
  0x8d   : > { %v851_v45 = vpop.permute.xlu0 %850 }
  0x8e   : > { %v853_v46 = vunpack.i.h.bf16 %v851_v45  ;;  %v852_v47 = vunpack.i.l.bf16 %v851_v45 }
  0x90   : > { %v469_v51 = vsel %vm468_vm10, %v428_v48, %v852_v47  ;;  %v470_v52 = vsel %vm468_vm10, %v426_v36, %v853_v46 }
  0x91   : > { %v452_v49 = vpop.permute.xlu0 %451 }
  0x92   : > { %v856_v50 = vpop.permute.xlu1 %855  ;;  %v471_v55 = vsel %vm468_vm10, %v425_v40, %v452_v49 }
  0x93   : > { %v858_v53 = vunpack.i.h.bf16 %v856_v50  ;;  %v857_v54 = vunpack.i.l.bf16 %v856_v50 }
  0x95   : > { %v473_v56 = vsel %vm472_vm11, %v469_v51, %v857_v54  ;;  %v474_v57 = vsel %vm472_vm11, %v470_v52, %v858_v53 }
  0x96   : > { %v464_v58 = vpop.permute.xlu1 %463  ;;  %v476_v59 = vpack.c.bf16 %v474_v57, %v473_v56 }
  0x97   : > { %v475_v60 = vsel %vm472_vm11, %v471_v55, %v464_v58 }
  0x98   : > { %v477_v61 = vpack.c.bf16 %v475_v60, %v475_v60  ;;  %809 = vmatprep.mubr.msk.bf16.mxu0 %vm497_vm12, %v476_v59 }
  0x9a   : > { %810 = vmatmul.mubr.msk.bf16.vlgmr.msra.gmra.mrb[0].mxu0 %vm497_vm12, %v477_v61 }
  0xe9   : > { %v817_v62 = vpop.f32.mrb[0].mxu1 }
  0xea   : > { %v611_v63 = vpop.f32.mrb[1].mxu1 }
  0xeb   : > { %v818_v0 = vpop.f32.mrb[2].mxu1 }
  0xec   : > { %v614_v1 = vpop.f32.mrb[3].mxu1 }
 0x16d   : > { %v811_v6 = vpop.f32.mrb[0].mxu0 }
 0x16e   : > { %v551_v8 = vadd.f32 %v811_v6, %v784_v5  ;;  %v542_v9 = vpop.f32.mrb[1].mxu0 }
 0x16f   : > { %v543_v10 = vadd.f32 %v784_v5, %v542_v9  ;;  %v812_v12 = vpop.f32.mrb[2].mxu0 }
 0x170   : > { %v826_v13 = vadd.f32 %v817_v62, %v551_v8  ;;  %v545_v14 = vpop.f32.mrb[3].mxu0 }
 0x171   : > { %v829_v15 = vadd.f32 %v611_v63, %v543_v10  ;;  %v546_v16 = vadd.f32 %v784_v5, %v545_v14 }
 0x172   : > { %v827_v17 = vadd.f32 %v826_v13, %v789_v11 }
 0x173   : > { %v830_v18 = vadd.f32 %v829_v15, %v789_v11  ;;  %v832_v19 = vadd.f32 %v789_v11, %v546_v16 }
 0x174   : > { %630 = vst.msk [vmem:[#allocation2 + $0x10] sm:$0xff] %vm468_vm10, %v827_v17 }
 0x175   : > { %628 = vst.msk [vmem:[#allocation2] sm:$0xff] %vm468_vm10, %v830_v18  ;;  %v833_v20 = vadd.f32 %v832_v19, %v614_v1 }
 0x177   : > { %629 = vst.msk [vmem:[#allocation2 + $0x8] sm:$0xff] %vm468_vm10, %v833_v20 }
 0x17e   : > { %v631_v21 = vld [vmem:[#allocation2] ss:$3 sm:$0xff]  ;;  %v633_v22 = vld [vmem:[#allocation2 + $0x1] ss:$3 sm:$0xff]  ;;  %v635_v24 = vld [vmem:[#allocation2 + $0x2] ss:$3 sm:$0xff] }
 0x17f   : > { %v636_v23 = vmax.f32 %v631_v21, %v633_v22 }
 0x181   : > { %v637_v25 = vmax.f32 %v636_v23, %v635_v24 }
 0x183   : > { %v638_v26 = vsel %vm468_vm10, %v637_v25, 0.0 }
 0x184   : > { %v639_v27 = vrot.slane %v638_v26, 4 }
 0x186   : > { %v640_v28 = vadd.f32 %v639_v27, %v638_v26 }
 0x188   : > { %v641_v29 = vrot.slane %v640_v28, 2 }
 0x18a   : > { %v642_v30 = vadd.f32 %v641_v29, %v640_v28 }
 0x18c   : > { %v643_v31 = vrot.slane %v642_v30, 1 }
 0x18e   : > { %v644_v32 = vadd.f32 %v643_v31, %v642_v30 }
 0x190   : > { %v646_v33 = vmul.f32 0.125, %v644_v32 }
 0x192   : > { %v647_v34 = vpack.c.bf16 %v646_v33, %v646_v33 }
 0x194   : > { %822 = vmatmul.mubr.msk.bf16.vlgmr.msra.gmra.mrb[4].mxu1 %vm468_vm10, %v647_v34 }
 0x267   : > { %v690_v36 = vpop.f32.mrb[4].mxu1 }
 0x268   : > { %v691_v37 = vadd.f32 %v690_v36, %v649_v35  ;;  %v823_v38 = vpop.f32.mrb[5].mxu1 }
 0x269   : > { %v693_v39 = vpop.f32.mrb[6].mxu1 }
 0x26a   : > { %v793_v40 = vmul.f32 -1.442695, %v691_v37  ;;  %v824_v41 = vpop.f32.mrb[7].mxu1 }
 0x26c   : > { %861 = vpow2.f32 %v793_v40 }
 0x276   : > { %v862_v42 = vpop.eup %861 }
 0x277   : > { %v699_v43 = vadd.f32 1.0, %v862_v42 }
 0x279   : > { %863 = vrcp.f32 %v699_v43 }
 0x283   : > { %v864_v45 = vpop.eup %863 }
 0x284   : > { %v705_v46 = vrot.slane %v864_v45, %v704_v44 }
 0x286   : > { %v706_v47 = vmul.f32 %v705_v46, %v637_v25 }
 0x288   : > { %v707_v48 = vadd.f32 %v706_v47, %v705_v46 }
 0x28a   : > { %708 = vst.msk [vmem:[%s377_s27] sm:$0xff] %vm468_vm10, %v707_v48 }
 0x28b PF: > { %s20_s13 = sadd.s32 1, %s871_s13  }
 0x28c   : > { %p17_p4 = scmp.ge.s32.totalorder %s20_s13, 4  }
 0x28e   :  { %19 = sbr.rel (!%p17_p4) target bundleno = 1 (0x1), region = 95 }

// kernel: resblock_forward.2
= control target key start
LH: loop header
LB: loop body
LE: loop exit
PB: predicated region body
PF: predicated region fallthrough
CT: control target
= control target key end

     0   :  { %s638_s21 = smov 0   ;;  %s714_s0 = inlined_call_operand.vmem [shape: f32[2,24,4], index: 0, kind: input, shape index: {}]   ;;  %s715_s1 = inlined_call_operand.vmem [shape: f32[1,4], index: 1, kind: input, shape index: {}]   ;;  %s716_s2 = inlined_call_operand.vmem [shape: f32[1,4], index: 2, kind: input, shape index: {}]   ;;  %s717_s3 = inlined_call_operand.vmem [shape: bf16[12,8], index: 3, kind: input, shape index: {}]   ;;  %s718_s4 = inlined_call_operand.vmem [shape: f32[1,8], index: 4, kind: input, shape index: {}]   ;;  %s719_s5 = inlined_call_operand.vmem [shape: f32[2,24,8], index: 5, kind: output, shape index: {0}]   ;;  %s720_s6 = inlined_call_operand.vmem [shape: f32[2,8,8], index: 6, kind: output, shape index: {1}]  }
   0x1 LB: > { %s545_s22 = sadd.s32 4294967295, %s599_s21   ;;  %p549_p0 = scmp.ge.s32.totalorder %s599_s21, 1  ;;  %s599_s21 = sphi %s638_s21, %s17_s21  }
   0x2   : > { %p215_p1 = scmp.lt.s32.totalorder %s599_s21, 3 }
   0x4   : > { %p216_p2 = pnand %p549_p0, %p215_p1 }
   0x5   : > { %p249_p3 = scmp.lt.s32.totalorder (!%p216_p2), %s545_s22, 1  ;;  %v553_v0 = vld [vmem:[%s715_s1] ss:$0 sm:$0xff] (!%p216_p2)  ;;  %v290_v1 = vlaneseq (!%p216_p2)  ;;  %vm375_vm0 = vcmask (!%p216_p2), 1045504   ;;  %s601_s9 = smov (!%p216_p2), 4   ;;  %vm344_vm5 = vcmask (!%p216_p2), 31744  }
   0x6   : > { %219 = sbr.rel (%p216_p2) target bundleno = 391 (0x187), region = 40  ;;  %v554_v2 = vld [vmem:[%s716_s2] ss:$0 sm:$0xff] (!%p216_p2)  ;;  %s602_s10 = smov (!%p216_p2), 8   ;;  %vm348_vm6 = vcmask (!%p216_p2), 64512   ;;  %vm368_vm7 = vcmask (!%p216_p2), 97280  }
   0x7   : > { %v592_v9 = vld [vmem:[%s717_s3] sm:$0x3f] (!%p216_p2)   ;;  %v663_v10 = vshrl.u32 (!%p216_p2), %v290_v1, 7 }
   0x8   : > { %570 = vmatprep.subr.msk.bf16.mxu0 (!%p216_p2), %vm375_vm0, %v592_v9  ;;  %v377_v14 = vsel (!%p216_p2), %vm375_vm0, %v592_v9, 0  ;;  %v555_v51 = vld [vmem:[%s718_s4] ss:$0 sm:$0xff] (!%p216_p2) }
   0x9   : > { %565 = vmatpush3.bf16.msra.mxu0 (!%p216_p2), %v377_v14  ;;  %vm313_vm1 = vcmp.lt.s32.totalorder (!%p216_p2), %v663_v10, 7  ;;  %v293_v18 = vadd.s32 (!%p216_p2), 16, %v663_v10  ;;  %vm300_vm2 = vcmp.lt.s32.totalorder (!%p216_p2), %v663_v10, 1  ;;  %vm294_vm4 = vcmp.eq.s32.totalorder (!%p216_p2), %v663_v10, 0 }
   0xa   : > { %vm455_vm8 = vcmp.eq.s32.totalorder (!%p216_p2), %v663_v10, 1 }
   0xb   : > { %vm309_vm3 = vcmp.eq.s32.totalorder (!%p216_p2), %v293_v18, 23 }
   0xd   : > { %s722_s22 = smov (!%p249_p3, %s545_s22), 1 }
   0xe   : > { %s571_s23 = smul.u32 24, %s722_s22  ;;  %s552_s16 = sshll.u32 %s722_s22, 3 }
   0xf   : > { %s262_s19 = scalar_lea.vmem %s720_s6, %s552_s16 }
  0x10   : > { %s253_s28 = scalar_lea.vmem %s714_s0, %s571_s23  ;;  %s258_s15 = scalar_lea.vmem %s719_s5, %s571_s23 }
  0x11   : > { %v264_v3 = vld [vmem:[%s253_s28] sm:$0xff]  ;;  %v265_v4 = vld [vmem:[%s253_s28 + $0x8] sm:$0xff]  ;;  %v266_v5 = vld [vmem:[%s253_s28 + $0x10] sm:$0xff] }
  0x12   : > { %v274_v6 = vmul.f32 %v553_v0, %v264_v3  ;;  %v275_v7 = vmul.f32 %v553_v0, %v265_v4  ;;  %v276_v8 = vmul.f32 %v553_v0, %v266_v5 }
  0x14   : > { %v284_v11 = vadd.f32 %v554_v2, %v274_v6  ;;  %v285_v12 = vadd.f32 %v554_v2, %v275_v7  ;;  %v286_v13 = vadd.f32 %v554_v2, %v276_v8 }
  0x16   : > { %v287_v15 = vmax.f32 %v284_v11, 0.0  ;;  %v288_v16 = vmax.f32 %v285_v12, 0.0  ;;  %v289_v17 = vmax.f32 %v286_v13, 0.0 }
  0x18   : > { %v582_v19 = vpack.i.bf16 %v288_v16, %v287_v15  ;;  %v297_v20 = vrot.slane %v287_v15, 7  ;;  %v310_v21 = vrot.slane %v287_v15, 1  ;;  %v311_v22 = vrot.slane %v288_v16, 1 }
  0x19   : > { %v312_v23 = vrot.slane %v289_v17, 1  ;;  %v298_v24 = vrot.slane %v288_v16, 7  ;;  %v299_v25 = vrot.slane %v289_v17, 7 }
  0x1a   : > { %583 = vrot.lane.b32.xlu0 %v582_v19, %s601_s9  ;;  %v315_v26 = vsel %vm313_vm1, %v310_v21, %v311_v22 }
  0x1b   : > { %v314_v27 = vsel %vm313_vm1, %v311_v22, %v312_v23  ;;  %v301_v28 = vsel %vm300_vm2, %v298_v24, %v299_v25  ;;  %v302_v29 = vsel %vm300_vm2, %v297_v20, %v298_v24  ;;  %v316_v31 = vsel %vm313_vm1, %v312_v23, %v310_v21 }
  0x1c   : > { %v587_v30 = vpack.i.bf16 %v314_v27, %v315_v26  ;;  %v303_v32 = vsel %vm300_vm2, %v299_v25, %v297_v20  ;;  %v319_v33 = vsel %vm309_vm3, 0.0, %v316_v31 }
  0x1d   : > { %v304_v37 = vsel %vm294_vm4, 0.0, %v303_v32 }
  0x1e   : > { %588 = vrot.lane.b32.xlu1 %v587_v30, %s602_s10  ;;  %327 = vrot.lane.b32.xlu0 %v289_v17, %s601_s9 }
  0x22   : > { %339 = vrot.lane.b32.xlu1 %v319_v33, %s602_s10 }
  0x8c   : > { %v584_v34 = vpop.permute.xlu0 %583 }
  0x8d   : > { %v586_v35 = vunpack.i.h.bf16 %v584_v34  ;;  %v585_v36 = vunpack.i.l.bf16 %v584_v34 }
  0x8f   : > { %v345_v40 = vsel %vm344_vm5, %v304_v37, %v585_v36  ;;  %v346_v41 = vsel %vm344_vm5, %v302_v29, %v586_v35 }
  0x90   : > { %v589_v38 = vpop.permute.xlu1 %588  ;;  %v328_v39 = vpop.permute.xlu0 %327 }
  0x91   : > { %v591_v42 = vunpack.i.h.bf16 %v589_v38  ;;  %v590_v43 = vunpack.i.l.bf16 %v589_v38  ;;  %v347_v44 = vsel %vm344_vm5, %v301_v28, %v328_v39 }
  0x93   : > { %v349_v45 = vsel %vm348_vm6, %v345_v40, %v590_v43  ;;  %v350_v46 = vsel %vm348_vm6, %v346_v41, %v591_v42 }
  0x94   : > { %v340_v47 = vpop.permute.xlu1 %339  ;;  %v352_v48 = vpack.c.bf16 %v350_v46, %v349_v45 }
  0x95   : > { %v351_v49 = vsel %vm348_vm6, %v347_v44, %v340_v47 }
  0x96   : > { %v353_v50 = vpack.c.bf16 %v351_v49, %v351_v49  ;;  %566 = vmatprep.mubr.msk.bf16.mxu0 %vm368_vm7, %v352_v48 }
  0x98   : > { %567 = vmatmul.mubr.msk.bf16.vlgmr.msra.gmra.mrb[0].mxu0 %vm368_vm7, %v353_v50 }
 0x16b   : > { %v568_v52 = vpop.f32.mrb[0].mxu0 }
 0x16c   : > { %v422_v53 = vadd.f32 %v568_v52, %v555_v51  ;;  %v413_v54 = vpop.f32.mrb[1].mxu0 }
 0x16d   : > { %v414_v55 = vadd.f32 %v555_v51, %v413_v54  ;;  %v569_v56 = vpop.f32.mrb[2].mxu0 }
 0x16e   : > { %429 = vst.msk [vmem:[%s258_s15 + $0x10] sm:$0xff] %vm348_vm6, %v422_v53  ;;  %v416_v57 = vpop.f32.mrb[3].mxu0  ;;  %v443_v60 = vmul.f32 %v422_v53, %v422_v53  ;;  %v433_v1 = vsel %vm348_vm6, %v422_v53, 0.0 }
 0x16f   : > { %427 = vst.msk [vmem:[%s258_s15] sm:$0xff] %vm348_vm6, %v414_v55  ;;  %v441_v58 = vmul.f32 %v414_v55, %v414_v55  ;;  %v417_v59 = vadd.f32 %v555_v51, %v416_v57  ;;  %v430_v61 = vsel %vm348_vm6, %v414_v55, 0.0 }
 0x170   : > { %v447_v6 = vsel %vm348_vm6, %v443_v60, 0.0 }
 0x171   : > { %428 = vst.msk [vmem:[%s258_s15 + $0x8] sm:$0xff] %vm348_vm6, %v417_v59  ;;  %v431_v62 = vsel %vm348_vm6, %v417_v59, 0.0  ;;  %v442_v63 = vmul.f32 %v417_v59, %v417_v59  ;;  %v444_v2 = vsel %vm348_vm6, %v441_v58, 0.0 }
 0x172   : > { %v432_v0 = vadd.f32 %v431_v62, %v430_v61 }
 0x173   : > { %v445_v3 = vsel %vm348_vm6, %v442_v63, 0.0 }
 0x174   : > { %v434_v4 = vadd.f32 %v433_v1, %v432_v0  ;;  %v446_v5 = vadd.f32 %v445_v3, %v444_v2 }
 0x176   : > { %v435_v7 = vrot.slane %v434_v4, 4  ;;  %v448_v8 = vadd.f32 %v447_v6, %v446_v5 }
 0x178   : > { %v436_v9 = vadd.f32 %v435_v7, %v434_v4  ;;  %v449_v11 = vrot.slane %v448_v8, 4 }
 0x17a   : > { %v437_v12 = vrot.slane %v436_v9, 2  ;;  %v450_v13 = vadd.f32 %v449_v11, %v448_v8 }
 0x17c   : > { %v438_v14 = vadd.f32 %v437_v12, %v436_v9  ;;  %v451_v15 = vrot.slane %v450_v13, 2 }
 0x17e   : > { %v452_v16 = vadd.f32 %v451_v15, %v450_v13  ;;  %v439_v17 = vrot.slane %v438_v14, 1 }
 0x180   : > { %v453_v18 = vrot.slane %v452_v16, 1  ;;  %v440_v20 = vadd.f32 %v439_v17, %v438_v14 }
 0x182   : > { %v454_v19 = vadd.f32 %v453_v18, %v452_v16 }
 0x184   : > { %v456_v21 = vsel %vm455_vm8, %v454_v19, 0.0 }
 0x185   : > { %v457_v22 = vsel %vm294_vm4, %v440_v20, %v456_v21 }
 0x186   : > { %458 = vst.msk [vmem:[%s262_s19] sm:$0xff] %vm348_vm6, %v457_v22 }
 0x187 PF: > { %s17_s21 = sadd.s32 1, %s599_s21  }
 0x188   : > { %p14_p4 = scmp.ge.s32.totalorder %s17_s21, 4  }
 0x18a   :  { %16 = sbr.rel (!%p14_p4) target bundleno = 1 (0x1), region = 82 }

</bundles_post_ra>
